<compile_context>
chip_gen: v5e
topology: v5e:2x2
jax: 0.10.0
libtpu: 0.0.40
codegen_flags: <defaults>
</compile_context>

<pallas_src>
import functools

import jax
import jax.numpy as jnp
from jax.experimental import pallas as pl
from jax.experimental.pallas import tpu as pltpu


def _round_up(n, m):
    return ((n + m - 1) // m) * m


def _default_pack_rows():
    # 256-deep MXU (v6e/v7x): pack 8 rows (K = 32*8 = 256). 128-deep MXU (v5e): 4.
    try:
        kind = jax.devices()[0].device_kind.lower()
        if "v5 lite" in kind or "v5e" in kind or "v5litepod" in kind:
            return 4
    except Exception:
        pass
    return 8


def _mlp_kernel(x_ref, w1_ref, b1_ref, w2_ref, b2_ref, w3_ref, b3_ref, o_ref):
    # x_ref: (TBp, F*P) packed batch rows; w*_ref are block-diagonal-replicated.
    x = x_ref[...]
    h1 = jnp.dot(x, w1_ref[...], preferred_element_type=jnp.float32)
    h1 = jnp.maximum(h1 + b1_ref[...], 0.0)                         # (TBp, 64*P) f32
    h2 = jnp.dot(h1.astype(w2_ref.dtype), w2_ref[...],
                 preferred_element_type=jnp.float32)
    h2 = jnp.maximum(h2 + b2_ref[...], 0.0)                         # (TBp, 32*P) f32
    y = jnp.dot(h2.astype(w3_ref.dtype), w3_ref[...],
                preferred_element_type=jnp.float32)                 # (TBp, P)
    o_ref[...] = (y + b3_ref[...]).astype(o_ref.dtype)


@functools.partial(jax.jit, static_argnames=("block_rows", "pack_rows", "compute_dtype"))
def mlp_forward(x, params, *, block_rows=8192, pack_rows=None,
                compute_dtype=jnp.bfloat16):
    """x: (B, F) float32; params: dict of w1,b1,w2,b2,w3,b3 (weights stored (in, out))."""
    w1, b1, w2, b2, w3, b3 = (params[k] for k in ("w1", "b1", "w2", "b2", "w3", "b3"))
    B, F = x.shape
    P = pack_rows if pack_rows is not None else _default_pack_rows()
    cdt = jnp.dtype(compute_dtype)
    H1, H2 = w1.shape[1], w2.shape[1]            # 64, 32

    # Block-diagonal replicated weights: one MXU pass computes P batch rows at once.
    eye = jnp.eye(P, dtype=jnp.float32)
    w1_bd = jnp.kron(eye, w1).astype(cdt)        # (F*P,  H1*P)
    w2_bd = jnp.kron(eye, w2).astype(cdt)        # (H1*P, H2*P)
    w3_bd = jnp.kron(eye, w3).astype(cdt)        # (H2*P, P)
    b1_t = jnp.tile(b1.astype(jnp.float32), (1, P))                    # (1, H1*P)
    b2_t = jnp.tile(b2.astype(jnp.float32), (1, P))                    # (1, H2*P)
    b3_t = jnp.tile(b3.astype(jnp.float32).reshape(1, 1), (1, P))      # (1, P)

    # Tiling: TB original rows per grid step; multiple of 8*P so the packed tile is
    # sublane-aligned. Force >= 2 grid steps when the batch allows so v7x can shard
    # the "parallel" axis over both TensorCores (negligible cost on v5e/v6e).
    unit = 8 * P
    B_pad0 = _round_up(B, unit)
    tb_cap = max(_round_up(block_rows, unit), unit)
    n_tiles = pl.cdiv(B_pad0, tb_cap)
    if B_pad0 >= 2 * unit:
        n_tiles = max(n_tiles, 2)
    TB = _round_up(pl.cdiv(B_pad0, n_tiles), unit)
    n_tiles = pl.cdiv(B_pad0, TB)
    B_pad = n_tiles * TB
    TBp, Fp = TB // P, F * P

    xc = x.astype(cdt)
    if B_pad != B:
        xc = jnp.pad(xc, ((0, B_pad - B), (0, 0)))
    x_packed = xc.reshape(B_pad // P, Fp)        # row-major: P original rows per packed row

    def resident(a):  # full-array block, same block index every step -> stays in VMEM
        return pl.BlockSpec(a.shape, lambda i: (0,) * a.ndim)

    # VMEM budget: x double-buffer + f32/bf16 intermediates + resident weights (+headroom).
    isz = cdt.itemsize
    est = (2 * TBp * Fp * isz                                   # x (double-buffered)
           + 2 * TBp * P * 4                                    # out (double-buffered)
           + TBp * (H1 + H2) * P * (4 + isz)                    # h1/h2 f32 + bf16 casts
           + 2 * (w1_bd.size + w2_bd.size + w3_bd.size) * isz
           + 2 * (b1_t.size + b2_t.size + b3_t.size) * 4)
    vmem_limit = int(min(max(2 * est, 32 * 1024 * 1024), 48 * 1024 * 1024))

    out = pl.pallas_call(
        _mlp_kernel,
        out_shape=jax.ShapeDtypeStruct((B_pad // P, P), jnp.float32),
        grid=(n_tiles,),
        in_specs=[
            pl.BlockSpec((TBp, Fp), lambda i: (i, 0)),   # x: streamed per batch tile
            resident(w1_bd), resident(b1_t),
            resident(w2_bd), resident(b2_t),
            resident(w3_bd), resident(b3_t),
        ],
        out_specs=pl.BlockSpec((TBp, P), lambda i: (i, 0)),
        compiler_params=pltpu.CompilerParams(
            dimension_semantics=("parallel",),           # dual-TC on v7x; neutral elsewhere
            vmem_limit_bytes=vmem_limit,
        ),
    )(x_packed, w1_bd, b1_t, w2_bd, b2_t, w3_bd, b3_t)

    return out.reshape(B_pad, 1)[:B]


def init_params(key, encoded_shape):
    """Deterministic init mirroring PyTorch nn.Linear default (U[-1/sqrt(fan_in), +])."""
    dims = [(encoded_shape, 64), (64, 32), (32, 1)]
    params = {}
    for i, (fan_in, fan_out) in enumerate(dims, start=1):
        key, kw, kb = jax.random.split(key, 3)
        bound = 1.0 / jnp.sqrt(float(fan_in))
        params[f"w{i}"] = jax.random.uniform(
            kw, (fan_in, fan_out), jnp.float32, minval=-bound, maxval=bound)
        params[f"b{i}"] = jax.random.uniform(
            kb, (1, fan_out), jnp.float32, minval=-bound, maxval=bound)
    return params


def mlp_reference(x, params):
    h1 = jnp.maximum(x @ params["w1"] + params["b1"], 0.0)
    h2 = jnp.maximum(h1 @ params["w2"] + params["b2"], 0.0)
    return h2 @ params["w3"] + params["b3"]


if __name__ == "__main__":
    key = jax.random.PRNGKey(0)
    encoded_shape = 32   # number of one-hot encoded input features
    batch = 8

    kp, kx = jax.random.split(key)
    params = init_params(kp, encoded_shape)
    x = jax.random.normal(kx, (batch, encoded_shape), jnp.float32)
    ref = mlp_reference(x, params)

    # f32 MXU path: tight-tolerance check against the JAX reference.
    out_f32 = jax.block_until_ready(mlp_forward(x, params, compute_dtype=jnp.float32))
    assert out_f32.shape == (batch, 1), out_f32.shape
    assert jnp.allclose(out_f32, ref, atol=1e-5, rtol=1e-5), "f32 mismatch vs JAX reference"

    # Default fast path (bf16 MXU operands, f32 accumulation): looser tolerance.
    out_bf16 = jax.block_until_ready(mlp_forward(x, params))
    assert out_bf16.shape == (batch, 1), out_bf16.shape
    assert jnp.allclose(out_bf16, ref, atol=5e-2, rtol=5e-2), "bf16 mismatch vs JAX reference"

    # Non-trivial grid: multiple batch tiles + padded remainder.
    kx2 = jax.random.fold_in(kx, 1)
    x_big = jax.random.normal(kx2, (1000, encoded_shape), jnp.float32)
    ref_big = mlp_reference(x_big, params)
    out_big = jax.block_until_ready(
        mlp_forward(x_big, params, block_rows=256, compute_dtype=jnp.float32))
    assert out_big.shape == (1000, 1)
    assert jnp.allclose(out_big, ref_big, atol=1e-5, rtol=1e-5)
    out_big_bf16 = jax.block_until_ready(mlp_forward(x_big, params, block_rows=256))
    assert jnp.allclose(out_big_bf16, ref_big, atol=5e-2, rtol=5e-2)

    print("KERNEL_OK")
</pallas_src>

<mosaic_0001>
module attributes {stable_mosaic.version = 11 : i64} {
  func.func @_mlp_kernel(%arg0: i32, %arg1: memref<8x256xf32, #tpu.memory_space<vmem>>, %arg2: memref<256x512xf32, #tpu.memory_space<vmem>>, %arg3: memref<1x512xf32, #tpu.memory_space<vmem>>, %arg4: memref<512x256xf32, #tpu.memory_space<vmem>>, %arg5: memref<1x256xf32, #tpu.memory_space<vmem>>, %arg6: memref<256x8xf32, #tpu.memory_space<vmem>>, %arg7: memref<1x8xf32, #tpu.memory_space<vmem>>, %arg8: memref<8x8xf32, #tpu.memory_space<vmem>>) attributes {dimension_semantics = [#tpu.dimension_semantics<parallel>], iteration_bounds = array<i64: 1>, scalar_prefetch = 0 : i64, scratch_operands = 0 : i64, tpu.core_type = #tpu.core_type<tc>, window_params = [{transform_indices = @transform_0, window_bounds = array<i64: 8, 256>}, {pipeline_mode = #tpu.pipeline_mode<synchronous>, transform_indices = @transform_1, window_bounds = array<i64: 256, 512>}, {pipeline_mode = #tpu.pipeline_mode<synchronous>, transform_indices = @transform_2, window_bounds = array<i64: 1, 512>}, {pipeline_mode = #tpu.pipeline_mode<synchronous>, transform_indices = @transform_3, window_bounds = array<i64: 512, 256>}, {pipeline_mode = #tpu.pipeline_mode<synchronous>, transform_indices = @transform_4, window_bounds = array<i64: 1, 256>}, {pipeline_mode = #tpu.pipeline_mode<synchronous>, transform_indices = @transform_5, window_bounds = array<i64: 256, 8>}, {pipeline_mode = #tpu.pipeline_mode<synchronous>, transform_indices = @transform_6, window_bounds = array<i64: 1, 8>}, {transform_indices = @transform_7, window_bounds = array<i64: 8, 8>}]} {
    %c0 = arith.constant 0 : index
    %c0_0 = arith.constant 0 : index
    %0 = vector.load %arg1[%c0, %c0_0] : memref<8x256xf32, #tpu.memory_space<vmem>>, vector<8x256xf32>
    %c0_1 = arith.constant 0 : index
    %c0_2 = arith.constant 0 : index
    %1 = vector.load %arg2[%c0_1, %c0_2] : memref<256x512xf32, #tpu.memory_space<vmem>>, vector<256x512xf32>
    %cst = arith.constant dense<0.000000e+00> : vector<8x512xf32>
    %2 = tpu.matmul %0, %1, %cst {dimension_numbers = #tpu.dot_dimension_numbers<[1], [0], [0], [1], [0, 0, 1, 1], [], []>} : vector<8x256xf32>, vector<256x512xf32>, vector<8x512xf32> -> vector<8x512xf32>
    %c0_3 = arith.constant 0 : index
    %c0_4 = arith.constant 0 : index
    %3 = vector.load %arg3[%c0_3, %c0_4] : memref<1x512xf32, #tpu.memory_space<vmem>>, vector<1x512xf32>
    %4 = vector.broadcast %3 : vector<1x512xf32> to vector<8x512xf32>
    %5 = arith.addf %2, %4 : vector<8x512xf32>
    %cst_5 = arith.constant 0.000000e+00 : f32
    %6 = vector.broadcast %cst_5 : f32 to vector<8x512xf32>
    %7 = arith.maximumf %5, %6 : vector<8x512xf32>
    %c0_6 = arith.constant 0 : index
    %c0_7 = arith.constant 0 : index
    %8 = vector.load %arg4[%c0_6, %c0_7] : memref<512x256xf32, #tpu.memory_space<vmem>>, vector<512x256xf32>
    %cst_8 = arith.constant dense<0.000000e+00> : vector<8x256xf32>
    %9 = tpu.matmul %7, %8, %cst_8 {dimension_numbers = #tpu.dot_dimension_numbers<[1], [0], [0], [1], [0, 0, 1, 1], [], []>} : vector<8x512xf32>, vector<512x256xf32>, vector<8x256xf32> -> vector<8x256xf32>
    %c0_9 = arith.constant 0 : index
    %c0_10 = arith.constant 0 : index
    %10 = vector.load %arg5[%c0_9, %c0_10] : memref<1x256xf32, #tpu.memory_space<vmem>>, vector<1x256xf32>
    %11 = vector.broadcast %10 : vector<1x256xf32> to vector<8x256xf32>
    %12 = arith.addf %9, %11 : vector<8x256xf32>
    %cst_11 = arith.constant 0.000000e+00 : f32
    %13 = vector.broadcast %cst_11 : f32 to vector<8x256xf32>
    %14 = arith.maximumf %12, %13 : vector<8x256xf32>
    %c0_12 = arith.constant 0 : index
    %c0_13 = arith.constant 0 : index
    %15 = vector.load %arg6[%c0_12, %c0_13] : memref<256x8xf32, #tpu.memory_space<vmem>>, vector<256x8xf32>
    %cst_14 = arith.constant dense<0.000000e+00> : vector<8x8xf32>
    %16 = tpu.matmul %14, %15, %cst_14 {dimension_numbers = #tpu.dot_dimension_numbers<[1], [0], [0], [1], [0, 0, 1, 1], [], []>} : vector<8x256xf32>, vector<256x8xf32>, vector<8x8xf32> -> vector<8x8xf32>
    %c0_15 = arith.constant 0 : index
    %c0_16 = arith.constant 0 : index
    %17 = vector.load %arg7[%c0_15, %c0_16] : memref<1x8xf32, #tpu.memory_space<vmem>>, vector<1x8xf32>
    %18 = vector.broadcast %17 : vector<1x8xf32> to vector<8x8xf32>
    %19 = arith.addf %16, %18 : vector<8x8xf32>
    %c0_17 = arith.constant 0 : index
    %c0_18 = arith.constant 0 : index
    %20 = vector.load %arg8[%c0_17, %c0_18] : memref<8x8xf32, #tpu.memory_space<vmem>>, vector<8x8xf32>
    tpu.vector_store %arg8[%c0_17, %c0_18], %19 {strides = array<i32>} : memref<8x8xf32, #tpu.memory_space<vmem>>, vector<8x8xf32>,
    return
  }
  func.func @transform_0(%arg0: i32) -> (i32, i32) {
    %c0_i32 = arith.constant 0 : i32
    %c0_i32_0 = arith.constant 0 : i32
    return %arg0, %c0_i32 : i32, i32
  }
  func.func @transform_1(%arg0: i32) -> (i32, i32) {
    %c0_i32 = arith.constant 0 : i32
    %c0_i32_0 = arith.constant 0 : i32
    %c0_i32_1 = arith.constant 0 : i32
    return %c0_i32, %c0_i32_0 : i32, i32
  }
  func.func @transform_2(%arg0: i32) -> (i32, i32) {
    %c0_i32 = arith.constant 0 : i32
    %c0_i32_0 = arith.constant 0 : i32
    %c0_i32_1 = arith.constant 0 : i32
    return %c0_i32, %c0_i32_0 : i32, i32
  }
  func.func @transform_3(%arg0: i32) -> (i32, i32) {
    %c0_i32 = arith.constant 0 : i32
    %c0_i32_0 = arith.constant 0 : i32
    %c0_i32_1 = arith.constant 0 : i32
    return %c0_i32, %c0_i32_0 : i32, i32
  }
  func.func @transform_4(%arg0: i32) -> (i32, i32) {
    %c0_i32 = arith.constant 0 : i32
    %c0_i32_0 = arith.constant 0 : i32
    %c0_i32_1 = arith.constant 0 : i32
    return %c0_i32, %c0_i32_0 : i32, i32
  }
  func.func @transform_5(%arg0: i32) -> (i32, i32) {
    %c0_i32 = arith.constant 0 : i32
    %c0_i32_0 = arith.constant 0 : i32
    %c0_i32_1 = arith.constant 0 : i32
    return %c0_i32, %c0_i32_0 : i32, i32
  }
  func.func @transform_6(%arg0: i32) -> (i32, i32) {
    %c0_i32 = arith.constant 0 : i32
    %c0_i32_0 = arith.constant 0 : i32
    %c0_i32_1 = arith.constant 0 : i32
    return %c0_i32, %c0_i32_0 : i32, i32
  }
  func.func @transform_7(%arg0: i32) -> (i32, i32) {
    %c0_i32 = arith.constant 0 : i32
    %c0_i32_0 = arith.constant 0 : i32
    return %arg0, %c0_i32 : i32, i32
  }
}

</mosaic_0001>

<bundles_post_ra>
// kernel: mlp_forward.1
= control target key start
LH: loop header
LB: loop body
LE: loop exit
PB: predicated region body
PF: predicated region fallthrough
CT: control target
= control target key end

     0   :  { %vm702_vm0 = vcmask 64512   ;;  %s1643_s1 = inlined_call_operand.vmem [shape: f32[256,512], index: 1, kind: input, shape index: {}]   ;;  %s1644_s0 = inlined_call_operand.vmem [shape: f32[8,256], index: 0, kind: input, shape index: {}]   ;;  %s1645_s3 = inlined_call_operand.vmem [shape: f32[512,256], index: 3, kind: input, shape index: {}]   ;;  %s1646_s2 = inlined_call_operand.vmem [shape: f32[1,512], index: 2, kind: input, shape index: {}]   ;;  %s1647_s5 = inlined_call_operand.vmem [shape: f32[256,8], index: 5, kind: input, shape index: {}]   ;;  %s1648_s6 = inlined_call_operand.vmem [shape: f32[1,8], index: 6, kind: input, shape index: {}]   ;;  %s1649_s4 = inlined_call_operand.vmem [shape: f32[1,256], index: 4, kind: input, shape index: {}]   ;;  %s1650_s7 = inlined_call_operand.vmem [shape: f32[8,8], index: 7, kind: output, shape index: {}]  }
   0x1   :  { %v88_v0 = vld [vmem:[%s1643_s1 + $0x1e0] sm:$0xff]  ;;  %v89_v1 = vld [vmem:[%s1643_s1 + $0x1e8] sm:$0xff]  ;;  %v90_v62 = vld [vmem:[%s1643_s1 + $0x1f0] sm:$0xff] }
   0x2   :  { %v84_v2 = vld [vmem:[%s1643_s1 + $0x1c0] sm:$0xff]  ;;  %166 = vmatpush.msra.mxu0 %v88_v0  ;;  %206 = vmatpush.msra.mxu2 %v89_v1  ;;  %v85_v4 = vld [vmem:[%s1643_s1 + $0x1c8] sm:$0xff]  ;;  %v91_v63 = vld [vmem:[%s1643_s1 + $0x1f8] sm:$0xff] }
   0x3   :  { %v152_v3 = vld [vmem:[%s1643_s1 + $0x3e0] sm:$0xff]  ;;  %v153_v5 = vld [vmem:[%s1643_s1 + $0x3e8] sm:$0xff] }
   0x4   :  { %186 = vmatpush.msra.mxu1 %v152_v3  ;;  %226 = vmatpush.msra.mxu3 %v153_v5  ;;  %v80_v6 = vld [vmem:[%s1643_s1 + $0x1a0] sm:$0xff]  ;;  %v81_v8 = vld [vmem:[%s1643_s1 + $0x1a8] sm:$0xff]  ;;  %v154_v3 = vld [vmem:[%s1643_s1 + $0x3f0] sm:$0xff] }
   0x5   :  { %v148_v7 = vld [vmem:[%s1643_s1 + $0x3c0] sm:$0xff]  ;;  %167 = vmatpush.msra.mxu0 %v84_v2  ;;  %207 = vmatpush.msra.mxu2 %v85_v4  ;;  %v149_v9 = vld [vmem:[%s1643_s1 + $0x3c8] sm:$0xff]  ;;  %v86_v2 = vld [vmem:[%s1643_s1 + $0x1d0] sm:$0xff] }
   0x6   :  { %v144_v10 = vld [vmem:[%s1643_s1 + $0x3a0] sm:$0xff]  ;;  %187 = vmatpush.msra.mxu1 %v148_v7  ;;  %227 = vmatpush.msra.mxu3 %v149_v9  ;;  %v77_v12 = vld [vmem:[%s1643_s1 + $0x188] sm:$0xff]  ;;  %v87_v4 = vld [vmem:[%s1643_s1 + $0x1d8] sm:$0xff] }
   0x7   :  { %v76_v11 = vld [vmem:[%s1643_s1 + $0x180] sm:$0xff]  ;;  %v145_v13 = vld [vmem:[%s1643_s1 + $0x3a8] sm:$0xff]  ;;  %168 = vmatpush.msra.mxu0 %v80_v6  ;;  %208 = vmatpush.msra.mxu2 %v81_v8  ;;  %v155_v5 = vld [vmem:[%s1643_s1 + $0x3f8] sm:$0xff] }
   0x8   :  { %v140_v14 = vld [vmem:[%s1643_s1 + $0x380] sm:$0xff]  ;;  %v141_v15 = vld [vmem:[%s1643_s1 + $0x388] sm:$0xff]  ;;  %188 = vmatpush.msra.mxu1 %v144_v10  ;;  %228 = vmatpush.msra.mxu3 %v145_v13  ;;  %v82_v6 = vld [vmem:[%s1643_s1 + $0x1b0] sm:$0xff] }
   0x9   :  { %v72_v16 = vld [vmem:[%s1643_s1 + $0x160] sm:$0xff]  ;;  %v73_v17 = vld [vmem:[%s1643_s1 + $0x168] sm:$0xff]  ;;  %169 = vmatpush.msra.mxu0 %v76_v11  ;;  %209 = vmatpush.msra.mxu2 %v77_v12  ;;  %v150_v7 = vld [vmem:[%s1643_s1 + $0x3d0] sm:$0xff] }
   0xa   :  { %v136_v18 = vld [vmem:[%s1643_s1 + $0x360] sm:$0xff]  ;;  %v137_v19 = vld [vmem:[%s1643_s1 + $0x368] sm:$0xff]  ;;  %189 = vmatpush.msra.mxu1 %v140_v14  ;;  %229 = vmatpush.msra.mxu3 %v141_v15  ;;  %v83_v8 = vld [vmem:[%s1643_s1 + $0x1b8] sm:$0xff] }
   0xb   :  { %v68_v20 = vld [vmem:[%s1643_s1 + $0x140] sm:$0xff]  ;;  %v69_v21 = vld [vmem:[%s1643_s1 + $0x148] sm:$0xff]  ;;  %170 = vmatpush.msra.mxu0 %v72_v16  ;;  %210 = vmatpush.msra.mxu2 %v73_v17  ;;  %v151_v9 = vld [vmem:[%s1643_s1 + $0x3d8] sm:$0xff] }
   0xc   :  { %v132_v22 = vld [vmem:[%s1643_s1 + $0x340] sm:$0xff]  ;;  %v133_v23 = vld [vmem:[%s1643_s1 + $0x348] sm:$0xff]  ;;  %190 = vmatpush.msra.mxu1 %v136_v18  ;;  %230 = vmatpush.msra.mxu3 %v137_v19  ;;  %v78_v10 = vld [vmem:[%s1643_s1 + $0x190] sm:$0xff] }
   0xd   :  { %v64_v24 = vld [vmem:[%s1643_s1 + $0x120] sm:$0xff]  ;;  %v65_v25 = vld [vmem:[%s1643_s1 + $0x128] sm:$0xff]  ;;  %171 = vmatpush.msra.mxu0 %v68_v20  ;;  %211 = vmatpush.msra.mxu2 %v69_v21  ;;  %v146_v11 = vld [vmem:[%s1643_s1 + $0x3b0] sm:$0xff] }
   0xe   :  { %v128_v26 = vld [vmem:[%s1643_s1 + $0x320] sm:$0xff]  ;;  %v129_v27 = vld [vmem:[%s1643_s1 + $0x328] sm:$0xff]  ;;  %191 = vmatpush.msra.mxu1 %v132_v22  ;;  %231 = vmatpush.msra.mxu3 %v133_v23  ;;  %v79_v12 = vld [vmem:[%s1643_s1 + $0x198] sm:$0xff] }
   0xf   :  { %v60_v28 = vld [vmem:[%s1643_s1 + $0x100] sm:$0xff]  ;;  %v61_v29 = vld [vmem:[%s1643_s1 + $0x108] sm:$0xff]  ;;  %172 = vmatpush.msra.mxu0 %v64_v24  ;;  %212 = vmatpush.msra.mxu2 %v65_v25  ;;  %v147_v13 = vld [vmem:[%s1643_s1 + $0x3b8] sm:$0xff] }
  0x10   :  { %v124_v30 = vld [vmem:[%s1643_s1 + $0x300] sm:$0xff]  ;;  %v125_v31 = vld [vmem:[%s1643_s1 + $0x308] sm:$0xff]  ;;  %192 = vmatpush.msra.mxu1 %v128_v26  ;;  %232 = vmatpush.msra.mxu3 %v129_v27  ;;  %v74_v14 = vld [vmem:[%s1643_s1 + $0x170] sm:$0xff] }
  0x11   :  { %v56_v32 = vld [vmem:[%s1643_s1 + $0xe0] sm:$0xff]  ;;  %v57_v33 = vld [vmem:[%s1643_s1 + $0xe8] sm:$0xff]  ;;  %173 = vmatpush.msra.mxu0 %v60_v28  ;;  %213 = vmatpush.msra.mxu2 %v61_v29  ;;  %v142_v15 = vld [vmem:[%s1643_s1 + $0x390] sm:$0xff] }
  0x12   :  { %v120_v34 = vld [vmem:[%s1643_s1 + $0x2e0] sm:$0xff]  ;;  %v121_v35 = vld [vmem:[%s1643_s1 + $0x2e8] sm:$0xff]  ;;  %193 = vmatpush.msra.mxu1 %v124_v30  ;;  %233 = vmatpush.msra.mxu3 %v125_v31  ;;  %v75_v16 = vld [vmem:[%s1643_s1 + $0x178] sm:$0xff] }
  0x13   :  { %v52_v36 = vld [vmem:[%s1643_s1 + $0xc0] sm:$0xff]  ;;  %v53_v37 = vld [vmem:[%s1643_s1 + $0xc8] sm:$0xff]  ;;  %174 = vmatpush.msra.mxu0 %v56_v32  ;;  %214 = vmatpush.msra.mxu2 %v57_v33  ;;  %v143_v17 = vld [vmem:[%s1643_s1 + $0x398] sm:$0xff] }
  0x14   :  { %v116_v38 = vld [vmem:[%s1643_s1 + $0x2c0] sm:$0xff]  ;;  %v117_v39 = vld [vmem:[%s1643_s1 + $0x2c8] sm:$0xff]  ;;  %194 = vmatpush.msra.mxu1 %v120_v34  ;;  %234 = vmatpush.msra.mxu3 %v121_v35  ;;  %v70_v18 = vld [vmem:[%s1643_s1 + $0x150] sm:$0xff] }
  0x15   :  { %v48_v40 = vld [vmem:[%s1643_s1 + $0xa0] sm:$0xff]  ;;  %v49_v41 = vld [vmem:[%s1643_s1 + $0xa8] sm:$0xff]  ;;  %175 = vmatpush.msra.mxu0 %v52_v36  ;;  %215 = vmatpush.msra.mxu2 %v53_v37  ;;  %v138_v19 = vld [vmem:[%s1643_s1 + $0x370] sm:$0xff] }
  0x16   :  { %v112_v42 = vld [vmem:[%s1643_s1 + $0x2a0] sm:$0xff]  ;;  %v113_v43 = vld [vmem:[%s1643_s1 + $0x2a8] sm:$0xff]  ;;  %195 = vmatpush.msra.mxu1 %v116_v38  ;;  %235 = vmatpush.msra.mxu3 %v117_v39  ;;  %v71_v20 = vld [vmem:[%s1643_s1 + $0x158] sm:$0xff] }
  0x17   :  { %v44_v44 = vld [vmem:[%s1643_s1 + $0x80] sm:$0xff]  ;;  %v45_v45 = vld [vmem:[%s1643_s1 + $0x88] sm:$0xff]  ;;  %176 = vmatpush.msra.mxu0 %v48_v40  ;;  %216 = vmatpush.msra.mxu2 %v49_v41  ;;  %v139_v21 = vld [vmem:[%s1643_s1 + $0x378] sm:$0xff] }
  0x18   :  { %v108_v46 = vld [vmem:[%s1643_s1 + $0x280] sm:$0xff]  ;;  %v109_v47 = vld [vmem:[%s1643_s1 + $0x288] sm:$0xff]  ;;  %196 = vmatpush.msra.mxu1 %v112_v42  ;;  %236 = vmatpush.msra.mxu3 %v113_v43  ;;  %v66_v22 = vld [vmem:[%s1643_s1 + $0x130] sm:$0xff] }
  0x19   :  { %v40_v48 = vld [vmem:[%s1643_s1 + $0x60] sm:$0xff]  ;;  %v41_v49 = vld [vmem:[%s1643_s1 + $0x68] sm:$0xff]  ;;  %177 = vmatpush.msra.mxu0 %v44_v44  ;;  %217 = vmatpush.msra.mxu2 %v45_v45  ;;  %v134_v23 = vld [vmem:[%s1643_s1 + $0x350] sm:$0xff] }
  0x1a   :  { %v104_v50 = vld [vmem:[%s1643_s1 + $0x260] sm:$0xff]  ;;  %v105_v51 = vld [vmem:[%s1643_s1 + $0x268] sm:$0xff]  ;;  %197 = vmatpush.msra.mxu1 %v108_v46  ;;  %237 = vmatpush.msra.mxu3 %v109_v47  ;;  %v67_v24 = vld [vmem:[%s1643_s1 + $0x138] sm:$0xff] }
  0x1b   :  { %v36_v52 = vld [vmem:[%s1643_s1 + $0x40] sm:$0xff]  ;;  %v37_v53 = vld [vmem:[%s1643_s1 + $0x48] sm:$0xff]  ;;  %178 = vmatpush.msra.mxu0 %v40_v48  ;;  %218 = vmatpush.msra.mxu2 %v41_v49  ;;  %v135_v25 = vld [vmem:[%s1643_s1 + $0x358] sm:$0xff] }
  0x1c   :  { %v100_v54 = vld [vmem:[%s1643_s1 + $0x240] sm:$0xff]  ;;  %v101_v55 = vld [vmem:[%s1643_s1 + $0x248] sm:$0xff]  ;;  %198 = vmatpush.msra.mxu1 %v104_v50  ;;  %238 = vmatpush.msra.mxu3 %v105_v51  ;;  %v62_v26 = vld [vmem:[%s1643_s1 + $0x110] sm:$0xff] }
  0x1d   :  { %v32_v56 = vld [vmem:[%s1643_s1 + $0x20] sm:$0xff]  ;;  %v33_v57 = vld [vmem:[%s1643_s1 + $0x28] sm:$0xff]  ;;  %179 = vmatpush.msra.mxu0 %v36_v52  ;;  %219 = vmatpush.msra.mxu2 %v37_v53  ;;  %v130_v27 = vld [vmem:[%s1643_s1 + $0x330] sm:$0xff] }
  0x1e   :  { %v96_v58 = vld [vmem:[%s1643_s1 + $0x220] sm:$0xff]  ;;  %v97_v59 = vld [vmem:[%s1643_s1 + $0x228] sm:$0xff]  ;;  %199 = vmatpush.msra.mxu1 %v100_v54  ;;  %239 = vmatpush.msra.mxu3 %v101_v55  ;;  %v63_v28 = vld [vmem:[%s1643_s1 + $0x118] sm:$0xff] }
  0x1f   :  { %v28_v60 = vld [vmem:[%s1643_s1] sm:$0xff]  ;;  %v29_v61 = vld [vmem:[%s1643_s1 + $0x8] sm:$0xff]  ;;  %180 = vmatpush.msra.mxu0 %v32_v56  ;;  %220 = vmatpush.msra.mxu2 %v33_v57  ;;  %v131_v29 = vld [vmem:[%s1643_s1 + $0x338] sm:$0xff] }
  0x20   :  { %200 = vmatpush.msra.mxu1 %v96_v58  ;;  %240 = vmatpush.msra.mxu3 %v97_v59  ;;  %v92_v0 = vld [vmem:[%s1643_s1 + $0x200] sm:$0xff]  ;;  %v93_v1 = vld [vmem:[%s1643_s1 + $0x208] sm:$0xff]  ;;  %v58_v31 = vld [vmem:[%s1643_s1 + $0xf0] sm:$0xff] }
  0x21   :  { %181 = vmatpush.msra.mxu0 %v28_v60  ;;  %221 = vmatpush.msra.mxu2 %v29_v61  ;;  %v1034_v30 = vld [vmem:[%s1644_s0] sm:$0xff]  ;;  %v126_v32 = vld [vmem:[%s1643_s1 + $0x310] sm:$0xff]  ;;  %v59_v33 = vld [vmem:[%s1643_s1 + $0xf8] sm:$0xff] }
  0x22   :  { %201 = vmatpush.msra.mxu1 %v92_v0  ;;  %241 = vmatpush.msra.mxu3 %v93_v1  ;;  %v127_v34 = vld [vmem:[%s1643_s1 + $0x318] sm:$0xff]  ;;  %v54_v35 = vld [vmem:[%s1643_s1 + $0xd0] sm:$0xff]  ;;  %v1055_v36 = vld [vmem:[%s1644_s0 + $0x8] sm:$0xff] }
  0x23   :  { %246 = vmatpush.msrb.mxu0 %v90_v62  ;;  %286 = vmatpush.msrb.mxu2 %v91_v63  ;;  %v122_v37 = vld [vmem:[%s1643_s1 + $0x2f0] sm:$0xff]  ;;  %v55_v38 = vld [vmem:[%s1643_s1 + $0xd8] sm:$0xff] }
  0x24   :  { %266 = vmatpush.msrb.mxu1 %v154_v3  ;;  %306 = vmatpush.msrb.mxu3 %v155_v5  ;;  %v123_v39 = vld [vmem:[%s1643_s1 + $0x2f8] sm:$0xff]  ;;  %v118_v40 = vld [vmem:[%s1643_s1 + $0x2d0] sm:$0xff] }
  0x25   :  { %247 = vmatpush.msrb.mxu0 %v86_v2  ;;  %287 = vmatpush.msrb.mxu2 %v87_v4  ;;  %v50_v41 = vld [vmem:[%s1643_s1 + $0xb0] sm:$0xff]  ;;  %v51_v42 = vld [vmem:[%s1643_s1 + $0xb8] sm:$0xff] }
  0x26   :  { %267 = vmatpush.msrb.mxu1 %v150_v7  ;;  %307 = vmatpush.msrb.mxu3 %v151_v9  ;;  %v119_v43 = vld [vmem:[%s1643_s1 + $0x2d8] sm:$0xff]  ;;  %v46_v44 = vld [vmem:[%s1643_s1 + $0x90] sm:$0xff]  ;;  %v390_v7 = vld [vmem:[%s1645_s3 + $0x1e0] sm:$0xff] }
  0x27   :  { %248 = vmatpush.msrb.mxu0 %v82_v6  ;;  %288 = vmatpush.msrb.mxu2 %v83_v8  ;;  %v114_v45 = vld [vmem:[%s1643_s1 + $0x2b0] sm:$0xff]  ;;  %v47_v46 = vld [vmem:[%s1643_s1 + $0x98] sm:$0xff]  ;;  %v358_v6 = vld [vmem:[%s1645_s3 + $0xe0] sm:$0xff] }
  0x28   :  { %268 = vmatpush.msrb.mxu1 %v146_v11  ;;  %308 = vmatpush.msrb.mxu3 %v147_v13  ;;  %v115_v47 = vld [vmem:[%s1643_s1 + $0x2b8] sm:$0xff]  ;;  %v42_v48 = vld [vmem:[%s1643_s1 + $0x70] sm:$0xff]  ;;  %v422_v8 = vld [vmem:[%s1645_s3 + $0x2e0] sm:$0xff] }
  0x29   :  { %249 = vmatpush.msrb.mxu0 %v78_v10  ;;  %289 = vmatpush.msrb.mxu2 %v79_v12  ;;  %v110_v49 = vld [vmem:[%s1643_s1 + $0x290] sm:$0xff]  ;;  %v43_v50 = vld [vmem:[%s1643_s1 + $0x78] sm:$0xff]  ;;  %v454_v9 = vld [vmem:[%s1645_s3 + $0x3e0] sm:$0xff] }
  0x2a   :  { %269 = vmatpush.msrb.mxu1 %v142_v15  ;;  %309 = vmatpush.msrb.mxu3 %v143_v17  ;;  %v111_v51 = vld [vmem:[%s1643_s1 + $0x298] sm:$0xff]  ;;  %v38_v52 = vld [vmem:[%s1643_s1 + $0x50] sm:$0xff]  ;;  %v386_v15 = vld [vmem:[%s1645_s3 + $0x1c0] sm:$0xff] }
  0x2b   :  { %250 = vmatpush.msrb.mxu0 %v74_v14  ;;  %290 = vmatpush.msrb.mxu2 %v75_v16  ;;  %v106_v53 = vld [vmem:[%s1643_s1 + $0x270] sm:$0xff]  ;;  %v39_v54 = vld [vmem:[%s1643_s1 + $0x58] sm:$0xff]  ;;  %v354_v14 = vld [vmem:[%s1645_s3 + $0xc0] sm:$0xff] }
  0x2c   :  { %270 = vmatpush.msrb.mxu1 %v138_v19  ;;  %310 = vmatpush.msrb.mxu3 %v139_v21  ;;  %v107_v55 = vld [vmem:[%s1643_s1 + $0x278] sm:$0xff]  ;;  %v34_v56 = vld [vmem:[%s1643_s1 + $0x30] sm:$0xff]  ;;  %v418_v16 = vld [vmem:[%s1645_s3 + $0x2c0] sm:$0xff] }
  0x2d   :  { %251 = vmatpush.msrb.mxu0 %v70_v18  ;;  %291 = vmatpush.msrb.mxu2 %v71_v20  ;;  %v102_v57 = vld [vmem:[%s1643_s1 + $0x250] sm:$0xff]  ;;  %v35_v58 = vld [vmem:[%s1643_s1 + $0x38] sm:$0xff]  ;;  %v450_v17 = vld [vmem:[%s1645_s3 + $0x3c0] sm:$0xff] }
  0x2e   :  { %271 = vmatpush.msrb.mxu1 %v134_v23  ;;  %311 = vmatpush.msrb.mxu3 %v135_v25  ;;  %v103_v59 = vld [vmem:[%s1643_s1 + $0x258] sm:$0xff]  ;;  %v30_v60 = vld [vmem:[%s1643_s1 + $0x10] sm:$0xff]  ;;  %v382_v23 = vld [vmem:[%s1645_s3 + $0x1a0] sm:$0xff] }
  0x2f   :  { %252 = vmatpush.msrb.mxu0 %v66_v22  ;;  %292 = vmatpush.msrb.mxu2 %v67_v24  ;;  %v98_v61 = vld [vmem:[%s1643_s1 + $0x230] sm:$0xff]  ;;  %v31_v62 = vld [vmem:[%s1643_s1 + $0x18] sm:$0xff]  ;;  %v350_v22 = vld [vmem:[%s1645_s3 + $0xa0] sm:$0xff] }
  0x30   :  { %272 = vmatpush.msrb.mxu1 %v130_v27  ;;  %312 = vmatpush.msrb.mxu3 %v131_v29  ;;  %v99_v63 = vld [vmem:[%s1643_s1 + $0x238] sm:$0xff]  ;;  %v94_v0 = vld [vmem:[%s1643_s1 + $0x210] sm:$0xff]  ;;  %v414_v24 = vld [vmem:[%s1645_s3 + $0x2a0] sm:$0xff] }
  0x31   :  { %253 = vmatpush.msrb.mxu0 %v62_v26  ;;  %293 = vmatpush.msrb.mxu2 %v63_v28  ;;  %v95_v1 = vld [vmem:[%s1643_s1 + $0x218] sm:$0xff]  ;;  %v360_v2 = vld [vmem:[%s1645_s3 + $0xf0] sm:$0xff]  ;;  %v446_v25 = vld [vmem:[%s1645_s3 + $0x3a0] sm:$0xff] }
  0x32   :  { %222 = vmatmul.f32.vlgmr.msra.gmra.mxu2 %v1034_v30  ;;  %273 = vmatpush.msrb.mxu1 %v126_v32  ;;  %v392_v3 = vld [vmem:[%s1645_s3 + $0x1f0] sm:$0xff]  ;;  %v410_v32 = vld [vmem:[%s1645_s3 + $0x280] sm:$0xff] }
  0x33   :  { %254 = vmatpush.msrb.mxu0 %v58_v31  ;;  %294 = vmatpush.msrb.mxu2 %v59_v33  ;;  %v424_v4 = vld [vmem:[%s1645_s3 + $0x2f0] sm:$0xff]  ;;  %v378_v31 = vld [vmem:[%s1645_s3 + $0x180] sm:$0xff] }
  0x34   :  { %313 = vmatpush.msrb.mxu3 %v127_v34  ;;  %274 = vmatpush.msrb.mxu1 %v122_v37  ;;  %v456_v5 = vld [vmem:[%s1645_s3 + $0x3f0] sm:$0xff]  ;;  %v442_v33 = vld [vmem:[%s1645_s3 + $0x380] sm:$0xff] }
  0x35   :  { %255 = vmatpush.msrb.mxu0 %v54_v35  ;;  %242 = vmatmul.f32.vlgmr.msra.gmra.mxu3 %v1055_v36  ;;  %v356_v10 = vld [vmem:[%s1645_s3 + $0xd0] sm:$0xff] }
  0x36   :  { %295 = vmatpush.msrb.mxu2 %v55_v38  ;;  %314 = vmatpush.msrb.mxu3 %v123_v39  ;;  %v388_v11 = vld [vmem:[%s1645_s3 + $0x1d0] sm:$0xff]  ;;  %v342_v38 = vld [vmem:[%s1645_s3 + $0x60] sm:$0xff] }
  0x37   :  { %182 = vmatmul.f32.vlgmr.msra.gmra.mxu0 %v1034_v30  ;;  %275 = vmatpush.msrb.mxu1 %v118_v40  ;;  %v420_v12 = vld [vmem:[%s1645_s3 + $0x2d0] sm:$0xff]  ;;  %v374_v39 = vld [vmem:[%s1645_s3 + $0x160] sm:$0xff] }
  0x38   :  { %256 = vmatpush.msrb.mxu0 %v50_v41  ;;  %296 = vmatpush.msrb.mxu2 %v51_v42  ;;  %v452_v13 = vld [vmem:[%s1645_s3 + $0x3d0] sm:$0xff]  ;;  %v406_v40 = vld [vmem:[%s1645_s3 + $0x260] sm:$0xff] }
  0x39   :  { %315 = vmatpush.msrb.mxu3 %v119_v43  ;;  %202 = vmatmul.f32.vlgmr.msra.gmra.mxu1 %v1055_v36  ;;  %v352_v18 = vld [vmem:[%s1645_s3 + $0xb0] sm:$0xff]  ;;  %v438_v41 = vld [vmem:[%s1645_s3 + $0x360] sm:$0xff] }
  0x3a   :  { %257 = vmatpush.msrb.mxu0 %v46_v44  ;;  %276 = vmatpush.msrb.mxu1 %v114_v45  ;;  %v384_v19 = vld [vmem:[%s1645_s3 + $0x1b0] sm:$0xff] }
  0x3b   :  { %297 = vmatpush.msrb.mxu2 %v47_v46  ;;  %316 = vmatpush.msrb.mxu3 %v115_v47  ;;  %v416_v20 = vld [vmem:[%s1645_s3 + $0x2b0] sm:$0xff]  ;;  %v338_v46 = vld [vmem:[%s1645_s3 + $0x40] sm:$0xff] }
  0x3c   :  { %258 = vmatpush.msrb.mxu0 %v42_v48  ;;  %277 = vmatpush.msrb.mxu1 %v110_v49  ;;  %v448_v21 = vld [vmem:[%s1645_s3 + $0x3b0] sm:$0xff]  ;;  %v370_v47 = vld [vmem:[%s1645_s3 + $0x140] sm:$0xff] }
  0x3d   :  { %298 = vmatpush.msrb.mxu2 %v43_v50  ;;  %317 = vmatpush.msrb.mxu3 %v111_v51  ;;  %v348_v26 = vld [vmem:[%s1645_s3 + $0x90] sm:$0xff]  ;;  %v402_v48 = vld [vmem:[%s1645_s3 + $0x240] sm:$0xff] }
  0x3e   :  { %259 = vmatpush.msrb.mxu0 %v38_v52  ;;  %278 = vmatpush.msrb.mxu1 %v106_v53  ;;  %v380_v27 = vld [vmem:[%s1645_s3 + $0x190] sm:$0xff]  ;;  %v434_v49 = vld [vmem:[%s1645_s3 + $0x340] sm:$0xff] }
  0x3f   :  { %299 = vmatpush.msrb.mxu2 %v39_v54  ;;  %318 = vmatpush.msrb.mxu3 %v107_v55  ;;  %v412_v28 = vld [vmem:[%s1645_s3 + $0x290] sm:$0xff]  ;;  %v334_v54 = vld [vmem:[%s1645_s3 + $0x20] sm:$0xff] }
  0x40   :  { %260 = vmatpush.msrb.mxu0 %v34_v56  ;;  %279 = vmatpush.msrb.mxu1 %v102_v57  ;;  %v444_v29 = vld [vmem:[%s1645_s3 + $0x390] sm:$0xff]  ;;  %v366_v55 = vld [vmem:[%s1645_s3 + $0x120] sm:$0xff] }
  0x41   :  { %300 = vmatpush.msrb.mxu2 %v35_v58  ;;  %319 = vmatpush.msrb.mxu3 %v103_v59  ;;  %v344_v34 = vld [vmem:[%s1645_s3 + $0x70] sm:$0xff]  ;;  %v398_v56 = vld [vmem:[%s1645_s3 + $0x220] sm:$0xff] }
  0x42   :  { %261 = vmatpush.msrb.mxu0 %v30_v60  ;;  %280 = vmatpush.msrb.mxu1 %v98_v61  ;;  %v376_v35 = vld [vmem:[%s1645_s3 + $0x170] sm:$0xff]  ;;  %v430_v57 = vld [vmem:[%s1645_s3 + $0x320] sm:$0xff] }
  0x43   :  { %301 = vmatpush.msrb.mxu2 %v31_v62  ;;  %320 = vmatpush.msrb.mxu3 %v99_v63  ;;  %v440_v37 = vld [vmem:[%s1645_s3 + $0x370] sm:$0xff]  ;;  %v330_v62 = vld [vmem:[%s1645_s3] sm:$0xff] }
  0x44   :  { %262 = vmatmul.f32.vlgmr.msrb.gmra.mxu0 %v1034_v30  ;;  %302 = vmatmul.f32.vlgmr.msrb.gmra.mxu2 %v1034_v30  ;;  %v346_v30 = vld [vmem:[%s1645_s3 + $0x80] sm:$0xff]  ;;  %v340_v42 = vld [vmem:[%s1645_s3 + $0x50] sm:$0xff] }
  0x45   :  { %281 = vmatpush.msrb.mxu1 %v94_v0  ;;  %321 = vmatpush.msrb.mxu3 %v95_v1  ;;  %v372_v43 = vld [vmem:[%s1645_s3 + $0x150] sm:$0xff]  ;;  %v362_v63 = vld [vmem:[%s1645_s3 + $0x100] sm:$0xff]  ;;  %v361_v0 = vld [vmem:[%s1645_s3 + $0xf8] sm:$0xff] }
  0x46   :  { %282 = vmatmul.f32.vlgmr.msrb.gmra.mxu1 %v1055_v36  ;;  %322 = vmatmul.f32.vlgmr.msrb.gmra.mxu3 %v1055_v36  ;;  %v408_v36 = vld [vmem:[%s1645_s3 + $0x270] sm:$0xff]  ;;  %v393_v1 = vld [vmem:[%s1645_s3 + $0x1f8] sm:$0xff] }
  0x47   :  { %464 = vmatpush.msra.mxu0 %v360_v2  ;;  %484 = vmatpush.msra.mxu1 %v392_v3  ;;  %v404_v44 = vld [vmem:[%s1645_s3 + $0x250] sm:$0xff]  ;;  %v394_v2 = vld [vmem:[%s1645_s3 + $0x200] sm:$0xff]  ;;  %v359_v3 = vld [vmem:[%s1645_s3 + $0xe8] sm:$0xff] }
  0x48   :  { %504 = vmatpush.msra.mxu2 %v424_v4  ;;  %524 = vmatpush.msra.mxu3 %v456_v5  ;;  %v436_v45 = vld [vmem:[%s1645_s3 + $0x350] sm:$0xff]  ;;  %v391_v4 = vld [vmem:[%s1645_s3 + $0x1e8] sm:$0xff]  ;;  %v425_v5 = vld [vmem:[%s1645_s3 + $0x2f8] sm:$0xff] }
  0x49   :  { %465 = vmatpush.msra.mxu0 %v358_v6  ;;  %485 = vmatpush.msra.mxu1 %v390_v7  ;;  %v336_v50 = vld [vmem:[%s1645_s3 + $0x30] sm:$0xff]  ;;  %v357_v6 = vld [vmem:[%s1645_s3 + $0xd8] sm:$0xff] }
  0x4a   :  { %505 = vmatpush.msra.mxu2 %v422_v8  ;;  %525 = vmatpush.msra.mxu3 %v454_v9  ;;  %v368_v51 = vld [vmem:[%s1645_s3 + $0x130] sm:$0xff]  ;;  %v389_v7 = vld [vmem:[%s1645_s3 + $0x1d8] sm:$0xff]  ;;  %v423_v8 = vld [vmem:[%s1645_s3 + $0x2e8] sm:$0xff] }
  0x4b   :  { %466 = vmatpush.msra.mxu0 %v356_v10  ;;  %486 = vmatpush.msra.mxu1 %v388_v11  ;;  %v400_v52 = vld [vmem:[%s1645_s3 + $0x230] sm:$0xff]  ;;  %v355_v9 = vld [vmem:[%s1645_s3 + $0xc8] sm:$0xff]  ;;  %v353_v11 = vld [vmem:[%s1645_s3 + $0xb8] sm:$0xff] }
  0x4c   :  { %506 = vmatpush.msra.mxu2 %v420_v12  ;;  %526 = vmatpush.msra.mxu3 %v452_v13  ;;  %v432_v53 = vld [vmem:[%s1645_s3 + $0x330] sm:$0xff]  ;;  %v387_v10 = vld [vmem:[%s1645_s3 + $0x1c8] sm:$0xff]  ;;  %v385_v12 = vld [vmem:[%s1645_s3 + $0x1b8] sm:$0xff] }
  0x4d   :  { %467 = vmatpush.msra.mxu0 %v354_v14  ;;  %487 = vmatpush.msra.mxu1 %v386_v15  ;;  %v332_v58 = vld [vmem:[%s1645_s3 + $0x10] sm:$0xff]  ;;  %v351_v13 = vld [vmem:[%s1645_s3 + $0xa8] sm:$0xff]  ;;  %v349_v15 = vld [vmem:[%s1645_s3 + $0x98] sm:$0xff] }
  0x4e   :  { %507 = vmatpush.msra.mxu2 %v418_v16  ;;  %527 = vmatpush.msra.mxu3 %v450_v17  ;;  %v364_v59 = vld [vmem:[%s1645_s3 + $0x110] sm:$0xff]  ;;  %v383_v14 = vld [vmem:[%s1645_s3 + $0x1a8] sm:$0xff]  ;;  %v381_v16 = vld [vmem:[%s1645_s3 + $0x198] sm:$0xff] }
  0x4f   :  { %468 = vmatpush.msra.mxu0 %v352_v18  ;;  %488 = vmatpush.msra.mxu1 %v384_v19  ;;  %v396_v60 = vld [vmem:[%s1645_s3 + $0x210] sm:$0xff]  ;;  %v347_v17 = vld [vmem:[%s1645_s3 + $0x88] sm:$0xff]  ;;  %v345_v18 = vld [vmem:[%s1645_s3 + $0x78] sm:$0xff] }
  0x50   :  { %508 = vmatpush.msra.mxu2 %v416_v20  ;;  %528 = vmatpush.msra.mxu3 %v448_v21  ;;  %v428_v61 = vld [vmem:[%s1645_s3 + $0x310] sm:$0xff]  ;;  %v379_v19 = vld [vmem:[%s1645_s3 + $0x188] sm:$0xff]  ;;  %v421_v20 = vld [vmem:[%s1645_s3 + $0x2d8] sm:$0xff] }
  0x51   :  { %469 = vmatpush.msra.mxu0 %v350_v22  ;;  %489 = vmatpush.msra.mxu1 %v382_v23  ;;  %v426_v21 = vld [vmem:[%s1645_s3 + $0x300] sm:$0xff]  ;;  %v343_v22 = vld [vmem:[%s1645_s3 + $0x68] sm:$0xff]  ;;  %v377_v23 = vld [vmem:[%s1645_s3 + $0x178] sm:$0xff] }
  0x52   :  { %509 = vmatpush.msra.mxu2 %v414_v24  ;;  %529 = vmatpush.msra.mxu3 %v446_v25  ;;  %v419_v24 = vld [vmem:[%s1645_s3 + $0x2c8] sm:$0xff]  ;;  %v457_v25 = vld [vmem:[%s1645_s3 + $0x3f8] sm:$0xff] }
  0x53   :  { %470 = vmatpush.msra.mxu0 %v348_v26  ;;  %490 = vmatpush.msra.mxu1 %v380_v27  ;;  %v341_v26 = vld [vmem:[%s1645_s3 + $0x58] sm:$0xff]  ;;  %v375_v27 = vld [vmem:[%s1645_s3 + $0x168] sm:$0xff] }
  0x54   :  { %510 = vmatpush.msra.mxu2 %v412_v28  ;;  %530 = vmatpush.msra.mxu3 %v444_v29  ;;  %v417_v28 = vld [vmem:[%s1645_s3 + $0x2b8] sm:$0xff]  ;;  %v455_v29 = vld [vmem:[%s1645_s3 + $0x3e8] sm:$0xff] }
  0x55   :  { %471 = vmatpush.msra.mxu0 %v346_v30  ;;  %491 = vmatpush.msra.mxu1 %v378_v31  ;;  %v339_v30 = vld [vmem:[%s1645_s3 + $0x48] sm:$0xff]  ;;  %v373_v31 = vld [vmem:[%s1645_s3 + $0x158] sm:$0xff] }
  0x56   :  { %511 = vmatpush.msra.mxu2 %v410_v32  ;;  %531 = vmatpush.msra.mxu3 %v442_v33  ;;  %v415_v32 = vld [vmem:[%s1645_s3 + $0x2a8] sm:$0xff]  ;;  %v453_v33 = vld [vmem:[%s1645_s3 + $0x3d8] sm:$0xff] }
  0x57   :  { %472 = vmatpush.msra.mxu0 %v344_v34  ;;  %492 = vmatpush.msra.mxu1 %v376_v35  ;;  %v337_v34 = vld [vmem:[%s1645_s3 + $0x38] sm:$0xff]  ;;  %v371_v35 = vld [vmem:[%s1645_s3 + $0x148] sm:$0xff] }
  0x58   :  { %512 = vmatpush.msra.mxu2 %v408_v36  ;;  %532 = vmatpush.msra.mxu3 %v440_v37  ;;  %v413_v36 = vld [vmem:[%s1645_s3 + $0x298] sm:$0xff]  ;;  %v451_v37 = vld [vmem:[%s1645_s3 + $0x3c8] sm:$0xff] }
  0x59   :  { %473 = vmatpush.msra.mxu0 %v342_v38  ;;  %493 = vmatpush.msra.mxu1 %v374_v39  ;;  %v335_v38 = vld [vmem:[%s1645_s3 + $0x28] sm:$0xff]  ;;  %v369_v39 = vld [vmem:[%s1645_s3 + $0x138] sm:$0xff] }
  0x5a   :  { %513 = vmatpush.msra.mxu2 %v406_v40  ;;  %533 = vmatpush.msra.mxu3 %v438_v41  ;;  %v411_v40 = vld [vmem:[%s1645_s3 + $0x288] sm:$0xff]  ;;  %v449_v41 = vld [vmem:[%s1645_s3 + $0x3b8] sm:$0xff] }
  0x5b   :  { %474 = vmatpush.msra.mxu0 %v340_v42  ;;  %494 = vmatpush.msra.mxu1 %v372_v43  ;;  %v333_v42 = vld [vmem:[%s1645_s3 + $0x18] sm:$0xff]  ;;  %v367_v43 = vld [vmem:[%s1645_s3 + $0x128] sm:$0xff] }
  0x5c   :  { %514 = vmatpush.msra.mxu2 %v404_v44  ;;  %534 = vmatpush.msra.mxu3 %v436_v45  ;;  %v409_v44 = vld [vmem:[%s1645_s3 + $0x278] sm:$0xff]  ;;  %v447_v45 = vld [vmem:[%s1645_s3 + $0x3a8] sm:$0xff] }
  0x5d   :  { %475 = vmatpush.msra.mxu0 %v338_v46  ;;  %495 = vmatpush.msra.mxu1 %v370_v47  ;;  %v331_v46 = vld [vmem:[%s1645_s3 + $0x8] sm:$0xff]  ;;  %v365_v47 = vld [vmem:[%s1645_s3 + $0x118] sm:$0xff] }
  0x5e   :  { %515 = vmatpush.msra.mxu2 %v402_v48  ;;  %535 = vmatpush.msra.mxu3 %v434_v49  ;;  %v407_v48 = vld [vmem:[%s1645_s3 + $0x268] sm:$0xff]  ;;  %v445_v49 = vld [vmem:[%s1645_s3 + $0x398] sm:$0xff] }
  0x5f   :  { %476 = vmatpush.msra.mxu0 %v336_v50  ;;  %496 = vmatpush.msra.mxu1 %v368_v51  ;;  %v363_v50 = vld [vmem:[%s1645_s3 + $0x108] sm:$0xff]  ;;  %v405_v51 = vld [vmem:[%s1645_s3 + $0x258] sm:$0xff] }
  0x60   :  { %516 = vmatpush.msra.mxu2 %v400_v52  ;;  %536 = vmatpush.msra.mxu3 %v432_v53  ;;  %v443_v52 = vld [vmem:[%s1645_s3 + $0x388] sm:$0xff] }
  0x61   :  { %477 = vmatpush.msra.mxu0 %v334_v54  ;;  %497 = vmatpush.msra.mxu1 %v366_v55  ;;  %v403_v53 = vld [vmem:[%s1645_s3 + $0x248] sm:$0xff]  ;;  %v441_v54 = vld [vmem:[%s1645_s3 + $0x378] sm:$0xff] }
  0x62   :  { %517 = vmatpush.msra.mxu2 %v398_v56  ;;  %537 = vmatpush.msra.mxu3 %v430_v57  ;;  %v401_v55 = vld [vmem:[%s1645_s3 + $0x238] sm:$0xff]  ;;  %v439_v56 = vld [vmem:[%s1645_s3 + $0x368] sm:$0xff] }
  0x63   :  { %478 = vmatpush.msra.mxu0 %v332_v58  ;;  %498 = vmatpush.msra.mxu1 %v364_v59  ;;  %v399_v57 = vld [vmem:[%s1645_s3 + $0x228] sm:$0xff]  ;;  %v437_v58 = vld [vmem:[%s1645_s3 + $0x358] sm:$0xff] }
  0x64   :  { %518 = vmatpush.msra.mxu2 %v396_v60  ;;  %538 = vmatpush.msra.mxu3 %v428_v61  ;;  %v397_v59 = vld [vmem:[%s1645_s3 + $0x218] sm:$0xff]  ;;  %v435_v60 = vld [vmem:[%s1645_s3 + $0x348] sm:$0xff]  ;;  %v156_v61 = vld [vmem:[%s1646_s2] sm:$0xf] }
  0x65   :  { %479 = vmatpush.msra.mxu0 %v330_v62  ;;  %499 = vmatpush.msra.mxu1 %v362_v63  ;;  %v395_v62 = vld [vmem:[%s1645_s3 + $0x208] sm:$0xff]  ;;  %v433_v63 = vld [vmem:[%s1645_s3 + $0x338] sm:$0xff] }
  0x66   :  { %519 = vmatpush.msra.mxu2 %v394_v2  ;;  %539 = vmatpush.msra.mxu3 %v426_v21  ;;  %v429_v2 = vld [vmem:[%s1645_s3 + $0x318] sm:$0xff]  ;;  %v161_v21 = vperm.slane %v156_v61, 3 }
  0x67   :  { %544 = vmatpush.msrb.mxu0 %v361_v0  ;;  %564 = vmatpush.msrb.mxu1 %v393_v1  ;;  %v431_v0 = vld [vmem:[%s1645_s3 + $0x328] sm:$0xff]  ;;  %v158_v1 = vperm.slane %v156_v61, 0 }
  0x68   :  { %584 = vmatpush.msrb.mxu2 %v425_v5  ;;  %604 = vmatpush.msrb.mxu3 %v457_v25 }
  0x69   :  { %545 = vmatpush.msrb.mxu0 %v359_v3  ;;  %565 = vmatpush.msrb.mxu1 %v391_v4  ;;  %v159_v3 = vperm.slane %v156_v61, 1  ;;  %v427_v4 = vld [vmem:[%s1645_s3 + $0x308] sm:$0xff] }
  0x6a   :  { %585 = vmatpush.msrb.mxu2 %v423_v8  ;;  %605 = vmatpush.msrb.mxu3 %v455_v29  ;;  %v639_v29 = vld [vmem:[%s1647_s5 + $0x68] sm:$0xff] }
  0x6b   :  { %546 = vmatpush.msrb.mxu0 %v357_v6  ;;  %566 = vmatpush.msrb.mxu1 %v389_v7 }
  0x6c   :  { %586 = vmatpush.msrb.mxu2 %v421_v20  ;;  %606 = vmatpush.msrb.mxu3 %v453_v33  ;;  %v636_v33 = vld [vmem:[%s1647_s5 + $0x50] sm:$0xff] }
  0x6d   :  { %547 = vmatpush.msrb.mxu0 %v355_v9  ;;  %567 = vmatpush.msrb.mxu1 %v387_v10 }
  0x6e   :  { %587 = vmatpush.msrb.mxu2 %v419_v24  ;;  %607 = vmatpush.msrb.mxu3 %v451_v37  ;;  %v634_v37 = vld [vmem:[%s1647_s5 + $0x40] sm:$0xff] }
  0x6f   :  { %548 = vmatpush.msrb.mxu0 %v353_v11  ;;  %568 = vmatpush.msrb.mxu1 %v385_v12 }
  0x70   :  { %588 = vmatpush.msrb.mxu2 %v417_v28  ;;  %608 = vmatpush.msrb.mxu3 %v449_v41  ;;  %v640_v28 = vld [vmem:[%s1647_s5 + $0x70] sm:$0xff] }
  0x71   :  { %549 = vmatpush.msrb.mxu0 %v351_v13  ;;  %569 = vmatpush.msrb.mxu1 %v383_v14  ;;  %v641_v14 = vld [vmem:[%s1647_s5 + $0x78] sm:$0xff]  ;;  %v632_v41 = vld [vmem:[%s1647_s5 + $0x30] sm:$0xff] }
  0x72   :  { %589 = vmatpush.msrb.mxu2 %v415_v32  ;;  %609 = vmatpush.msrb.mxu3 %v447_v45  ;;  %v637_v32 = vld [vmem:[%s1647_s5 + $0x58] sm:$0xff]  ;;  %v630_v45 = vld [vmem:[%s1647_s5 + $0x20] sm:$0xff] }
  0x73   :  { %550 = vmatpush.msrb.mxu0 %v349_v15  ;;  %570 = vmatpush.msrb.mxu1 %v381_v16  ;;  %v160_v16 = vperm.slane %v156_v61, 2 }
  0x74   :  { %590 = vmatpush.msrb.mxu2 %v413_v36  ;;  %610 = vmatpush.msrb.mxu3 %v445_v49  ;;  %v655_v36 = vld [vmem:[%s1647_s5 + $0xe8] sm:$0xff]  ;;  %v628_v49 = vld [vmem:[%s1647_s5 + $0x10] sm:$0xff] }
  0x75   :  { %551 = vmatpush.msrb.mxu0 %v347_v17  ;;  %571 = vmatpush.msrb.mxu1 %v379_v19 }
  0x76   :  { %591 = vmatpush.msrb.mxu2 %v411_v40  ;;  %611 = vmatpush.msrb.mxu3 %v443_v52  ;;  %v653_v40 = vld [vmem:[%s1647_s5 + $0xd8] sm:$0xff]  ;;  %v647_v52 = vld [vmem:[%s1647_s5 + $0xa8] sm:$0xff] }
  0x77   :  { %552 = vmatpush.msrb.mxu0 %v345_v18  ;;  %572 = vmatpush.msrb.mxu1 %v377_v23 }
  0x78   :  { %592 = vmatpush.msrb.mxu2 %v409_v44  ;;  %612 = vmatpush.msrb.mxu3 %v441_v54  ;;  %v651_v44 = vld [vmem:[%s1647_s5 + $0xc8] sm:$0xff]  ;;  %v646_v54 = vld [vmem:[%s1647_s5 + $0xa0] sm:$0xff] }
  0x79   :  { %553 = vmatpush.msrb.mxu0 %v343_v22  ;;  %573 = vmatpush.msrb.mxu1 %v375_v27 }
  0x7a   :  { %593 = vmatpush.msrb.mxu2 %v407_v48  ;;  %613 = vmatpush.msrb.mxu3 %v439_v56  ;;  %v649_v48 = vld [vmem:[%s1647_s5 + $0xb8] sm:$0xff]  ;;  %v644_v56 = vld [vmem:[%s1647_s5 + $0x90] sm:$0xff] }
  0x7b   :  { %554 = vmatpush.msrb.mxu0 %v341_v26  ;;  %574 = vmatpush.msrb.mxu1 %v373_v31  ;;  %v657_v31 = vld [vmem:[%s1647_s5 + $0xf8] sm:$0xff] }
  0x7c   :  { %594 = vmatpush.msrb.mxu2 %v405_v51  ;;  %614 = vmatpush.msrb.mxu3 %v437_v58  ;;  %v627_v51 = vld [vmem:[%s1647_s5 + $0x8] sm:$0xff]  ;;  %v642_v58 = vld [vmem:[%s1647_s5 + $0x80] sm:$0xff] }
  0x7d   :  { %555 = vmatpush.msrb.mxu0 %v339_v30  ;;  %575 = vmatpush.msrb.mxu1 %v371_v35  ;;  %v638_v30 = vld [vmem:[%s1647_s5 + $0x60] sm:$0xff]  ;;  %v635_v35 = vld [vmem:[%s1647_s5 + $0x48] sm:$0xff] }
  0x7e   :  { %595 = vmatpush.msrb.mxu2 %v403_v53  ;;  %615 = vmatpush.msrb.mxu3 %v435_v60  ;;  %v626_v53 = vld [vmem:[%s1647_s5] sm:$0xff] }
  0x7f   :  { %556 = vmatpush.msrb.mxu0 %v337_v34  ;;  %576 = vmatpush.msrb.mxu1 %v369_v39  ;;  %v656_v34 = vld [vmem:[%s1647_s5 + $0xf0] sm:$0xff]  ;;  %v633_v39 = vld [vmem:[%s1647_s5 + $0x38] sm:$0xff] }
  0x80   :  { %596 = vmatpush.msrb.mxu2 %v401_v55  ;;  %616 = vmatpush.msrb.mxu3 %v433_v63  ;;  %v645_v55 = vld [vmem:[%s1647_s5 + $0x98] sm:$0xff] }
  0x81   :  { %557 = vmatpush.msrb.mxu0 %v335_v38  ;;  %577 = vmatpush.msrb.mxu1 %v367_v43  ;;  %v654_v38 = vld [vmem:[%s1647_s5 + $0xe0] sm:$0xff]  ;;  %v631_v43 = vld [vmem:[%s1647_s5 + $0x28] sm:$0xff] }
  0x82   :  { %597 = vmatpush.msrb.mxu2 %v399_v57  ;;  %617 = vmatpush.msrb.mxu3 %v431_v0  ;;  %v643_v57 = vld [vmem:[%s1647_s5 + $0x88] sm:$0xff] }
  0x83   :  { %558 = vmatpush.msrb.mxu0 %v333_v42  ;;  %578 = vmatpush.msrb.mxu1 %v365_v47  ;;  %v652_v42 = vld [vmem:[%s1647_s5 + $0xd0] sm:$0xff]  ;;  %v629_v47 = vld [vmem:[%s1647_s5 + $0x18] sm:$0xff] }
  0x84   :  { %598 = vmatpush.msrb.mxu2 %v397_v59  ;;  %618 = vmatpush.msrb.mxu3 %v429_v2  ;;  %v458_v59 = vld [vmem:[%s1649_s4] sm:$0x3] }
  0x85   :  { %559 = vmatpush.msrb.mxu0 %v331_v46  ;;  %579 = vmatpush.msrb.mxu1 %v363_v50  ;;  %v650_v46 = vld [vmem:[%s1647_s5 + $0xc0] sm:$0xff]  ;;  %v648_v50 = vld [vmem:[%s1647_s5 + $0xb0] sm:$0xff]  ;;  %v460_v61 = vperm.slane %v458_v59, 0  ;;  %v461_v2 = vperm.slane %v458_v59, 1 }
  0x86   :  { %599 = vmatpush.msrb.mxu2 %v395_v62  ;;  %619 = vmatpush.msrb.mxu3 %v427_v4 }
  0xb4   :  { %v183_v5 = vpop.f32.mrf.mxu0 }
  0xb5   :  { %v184_v6 = vadd.f32 %v183_v5, %v158_v1  ;;  %v223_v7 = vpop.f32.mrf.mxu2 }
  0xb6   :  { %v203_v8 = vpop.f32.mrf.mxu1  ;;  %v224_v9 = vadd.f32 %v223_v7, %v159_v3 }
  0xb7   :  { %v204_v10 = vadd.f32 %v203_v8, %v184_v6 }
  0xb8   :  { %v243_v11 = vpop.f32.mrf.mxu3 }
  0xb9   :  { %v326_v12 = vmax.f32 %v204_v10, 0.0  ;;  %v244_v13 = vadd.f32 %v243_v11, %v224_v9 }
  0xbb   :  { %v327_v15 = vmax.f32 %v244_v13, 0.0  ;;  %480 = vmatmul.f32.vlgmr.msra.gmra.mxu0 %v326_v12 }
  0xbc   :  { %662 = vmatpush.msra.mxu0 %v641_v14 }
  0xbd   :  { %500 = vmatmul.f32.vlgmr.msra.gmra.mxu1 %v327_v15 }
  0xbe   :  { %663 = vmatpush.msra.mxu0 %v640_v28  ;;  %682 = vmatpush.msra.mxu1 %v657_v31 }
  0xc0   :  { %664 = vmatpush.msra.mxu0 %v639_v29  ;;  %683 = vmatpush.msra.mxu1 %v656_v34 }
  0xc1   :  { %v263_v17 = vpop.f32.mrf.mxu0 }
  0xc2   :  { %v264_v18 = vadd.f32 %v263_v17, %v160_v16  ;;  %665 = vmatpush.msra.mxu0 %v638_v30  ;;  %684 = vmatpush.msra.mxu1 %v655_v36  ;;  %v708_v16 = vld [vmem:[%s1648_s6] ss:$0 sm:$0xff] }
  0xc3   :  { %v283_v19 = vpop.f32.mrf.mxu1  ;;  %560 = vmatmul.f32.vlgmr.msrb.gmra.mxu0 %v326_v12 }
  0xc4   :  { %v284_v20 = vadd.f32 %v283_v19, %v264_v18  ;;  %666 = vmatpush.msra.mxu0 %v637_v32  ;;  %685 = vmatpush.msra.mxu1 %v654_v38 }
  0xc5   :  { %580 = vmatmul.f32.vlgmr.msrb.gmra.mxu1 %v327_v15 }
  0xc6   :  { %v328_v22 = vmax.f32 %v284_v20, 0.0  ;;  %667 = vmatpush.msra.mxu0 %v636_v33  ;;  %686 = vmatpush.msra.mxu1 %v653_v40 }
  0xc7   :  { %v303_v23 = vpop.f32.mrf.mxu2 }
  0xc8   :  { %v304_v24 = vadd.f32 %v303_v23, %v161_v21  ;;  %520 = vmatmul.f32.vlgmr.msra.gmra.mxu2 %v328_v22  ;;  %668 = vmatpush.msra.mxu0 %v635_v35 }
  0xc9   :  { %v323_v25 = vpop.f32.mrf.mxu3  ;;  %687 = vmatpush.msra.mxu1 %v652_v42 }
  0xca   :  { %v324_v26 = vadd.f32 %v323_v25, %v304_v24  ;;  %669 = vmatpush.msra.mxu0 %v634_v37 }
  0xcb   :  { %688 = vmatpush.msra.mxu1 %v651_v44 }
  0xcc   :  { %v329_v27 = vmax.f32 %v324_v26, 0.0  ;;  %670 = vmatpush.msra.mxu0 %v633_v39 }
  0xcd   :  { %689 = vmatpush.msra.mxu1 %v650_v46 }
  0xce   :  { %540 = vmatmul.f32.vlgmr.msra.gmra.mxu3 %v329_v27  ;;  %671 = vmatpush.msra.mxu0 %v632_v41 }
  0xcf   :  { %690 = vmatpush.msra.mxu1 %v649_v48 }
  0xd0   :  { %600 = vmatmul.f32.vlgmr.msrb.gmra.mxu2 %v328_v22  ;;  %672 = vmatpush.msra.mxu0 %v631_v43 }
  0xd1   :  { %691 = vmatpush.msra.mxu1 %v648_v50 }
  0xd2   :  { %673 = vmatpush.msra.mxu0 %v630_v45 }
  0xd3   :  { %692 = vmatpush.msra.mxu1 %v647_v52 }
  0xd4   :  { %674 = vmatpush.msra.mxu0 %v629_v47 }
  0xd5   :  { %693 = vmatpush.msra.mxu1 %v646_v54 }
  0xd6   :  { %620 = vmatmul.f32.vlgmr.msrb.gmra.mxu3 %v329_v27  ;;  %675 = vmatpush.msra.mxu0 %v628_v49 }
  0xd7   :  { %694 = vmatpush.msra.mxu1 %v645_v55 }
  0xd8   :  { %676 = vmatpush.msra.mxu0 %v627_v51 }
  0xd9   :  { %695 = vmatpush.msra.mxu1 %v644_v56 }
  0xda   :  { %677 = vmatpush.msra.mxu0 %v626_v53 }
  0xdb   :  { %696 = vmatpush.msra.mxu1 %v643_v57 }
  0xdd   :  { %697 = vmatpush.msra.mxu1 %v642_v58 }
 0x138   :  { %v481_v60 = vpop.f32.mrf.mxu0 }
 0x139   :  { %v482_v63 = vadd.f32 %v481_v60, %v460_v61 }
 0x13a   :  { %v501_v62 = vpop.f32.mrf.mxu1 }
 0x13b   :  { %v502_v1 = vadd.f32 %v501_v62, %v482_v63 }
 0x140   :  { %v561_v3 = vpop.f32.mrf.mxu0 }
 0x141   :  { %v562_v6 = vadd.f32 %v561_v3, %v461_v2 }
 0x142   :  { %v581_v8 = vpop.f32.mrf.mxu1 }
 0x143   :  { %v582_v11 = vadd.f32 %v581_v8, %v562_v6 }
 0x14b   :  { %v521_v0 = vpop.f32.mrf.mxu2 }
 0x14c   :  { %v522_v4 = vadd.f32 %v521_v0, %v502_v1 }
 0x151   :  { %v541_v5 = vpop.f32.mrf.mxu3 }
 0x152   :  { %v542_v7 = vadd.f32 %v541_v5, %v522_v4 }
 0x153   :  { %v601_v10 = vpop.f32.mrf.mxu2 }
 0x154   :  { %v624_v9 = vmax.f32 %v542_v7, 0.0  ;;  %v602_v12 = vadd.f32 %v601_v10, %v582_v11 }
 0x156   :  { %678 = vmatmul.f32.vlgmr.msra.gmra.mxu0 %v624_v9 }
 0x159   :  { %v621_v13 = vpop.f32.mrf.mxu3 }
 0x15a   :  { %v622_v14 = vadd.f32 %v621_v13, %v602_v12 }
 0x15c   :  { %v625_v15 = vmax.f32 %v622_v14, 0.0 }
 0x15e   :  { %698 = vmatmul.f32.vlgmr.msra.gmra.mxu1 %v625_v15 }
 0x1d3   :  { %v679_v17 = vpop.f32.mrf.mxu0 }
 0x1d4   :  { %v680_v18 = vadd.f32 %v708_v16, %v679_v17 }
 0x1db   :  { %v699_v19 = vpop.f32.mrf.mxu1 }
 0x1dc   :  { %v700_v20 = vadd.f32 %v699_v19, %v680_v18 }
 0x1de   :  { %703 = vst.msk [vmem:[%s1650_s7] sm:$0xff] %vm702_vm0, %v700_v20 }

</bundles_post_ra>
